<compile_context>
chip_gen: v7x
topology: tpu7x:2x2x1
jax: 0.10.0
libtpu: 0.0.40
codegen_flags: <defaults>
</compile_context>

<pallas_src>
import functools

import jax
import jax.numpy as jnp
from jax import lax
from jax.experimental import pallas as pl
from jax.experimental.pallas import tpu as pltpu


KH = 4                                   # conv kernel height
PAD = 2                                  # conv padding along H
POOLS = (2, 2, 2, 1)                     # max-pool factor along H per layer
CONV_CHANNELS = ((2, 32), (32, 64), (64, 64), (64, 64))
LANE = 128


def _conv_h_out(h):
    # (h + 2*2 - (4 - 1) - 1) // 1 + 1  ==  h + 1
    return (h + 2 * PAD - (KH - 1) - 1) // 1 + 1


def _round_up(x, m):
    return (x + m - 1) // m * m


# ---------------------------------------------------------------------------
# Fused kernel: 4x (conv + relu + pool) + actor/critic head, all in VMEM.
# ---------------------------------------------------------------------------
def fused_dnn_kernel(x_ref,
                     m1_ref, b1_ref, m2_ref, b2_ref,
                     m3_ref, b3_ref, m4_ref, b4_ref,
                     wh_ref, bh_ref,
                     logits_ref, value_ref,
                     *, w_dim, b_dim, pools):
    """x_ref: (N, H*Cin) with N = W*B, row n = w*B + b, col = h*Cin + c.

    m*_ref : (H_in*Cin, width) banded conv matrices (padding + taps folded in,
             output columns ordered [even H positions | odd H positions] when
             pool == 2; last layer zero-padded to a multiple of 128 lanes).
    b*_ref : (1, width) tiled f32 biases.
    wh_ref : (8, W*F_pad) packed actor|critic head weights (rows = [actor .. ,
             critic, zero pad]; PyTorch (C,H,W) flatten order folded in).
    bh_ref : (1, 8) f32.
    logits_ref: (B, num_actions);  value_ref: (B, 1).
    """
    wdtype = m1_ref.dtype                                # bf16 (default) or f32

    def mm(a, m):
        return jnp.dot(a.astype(wdtype), m, preferred_element_type=jnp.float32)

    act = x_ref[...].astype(jnp.float32)                 # (N, H*Cin)

    layers = ((m1_ref, b1_ref), (m2_ref, b2_ref),
              (m3_ref, b3_ref), (m4_ref, b4_ref))
    for (m_ref, b_ref), pool in zip(layers, pools):
        u = mm(act, m_ref[...]) + b_ref[...]             # conv + bias (one matmul)
        u = jnp.maximum(u, 0.0)                          # ReLU (f32, VPU)
        if pool == 2:
            half = u.shape[1] // 2                       # lane-aligned split point
            act = jnp.maximum(u[:, :half], u[:, half:])  # vectorized (2,1) max-pool
        else:
            act = u                                      # (1,1) pool is identity

    # --- head: single lane-dense matmul -------------------------------------
    # act2[b, w*F + f] = act[w*B + b, f]  (B, W*F) via W sublane slices + lane concat.
    act2 = jnp.concatenate(
        [act[w * b_dim:(w + 1) * b_dim, :] for w in range(w_dim)], axis=1)
    # Contract over F with the (8, W*F) weight matrix (rhs contraction dim 1).
    res = lax.dot_general(act2.astype(wdtype), wh_ref[...],
                          dimension_numbers=(((1,), (1,)), ((), ())),
                          preferred_element_type=jnp.float32)
    res = res + bh_ref[...]                              # (B, 8)

    num_actions = logits_ref.shape[1]
    logits_ref[...] = res[:, :num_actions]
    value_ref[...] = res[:, num_actions:num_actions + 1]


# ---------------------------------------------------------------------------
# Parameter packing: PyTorch-layout weights -> kernel-friendly matmul matrices.
# (Done once, outside the forward hot path; weights stored in bf16 by default.)
# ---------------------------------------------------------------------------
def _build_conv_matrix(w_conv, b_conv, h_in, pool, dtype, pad_to_lane=False):
    """w_conv: (Cout, Cin, 4, 1) PyTorch layout.

    Returns (M, bias_row, h_next, width) with
      M[j*Cin + c, p*Cout + o] = W[o, c, j - i(p) + 2]  (zero outside the 4-tap band),
    output positions p ordered [even i | odd i] when pool == 2, and (optionally)
    zero-padded columns up to a multiple of 128 lanes.
    """
    cout, cin, kh, _ = w_conv.shape
    h_out = _conv_h_out(h_in)
    wt = jnp.transpose(w_conv[:, :, :, 0], (2, 1, 0))        # (KH, Cin, Cout)
    j = jnp.arange(h_in)[:, None]
    i = jnp.arange(h_out)[None, :]
    tap = j - i + PAD                                        # (h_in, h_out)
    valid = (tap >= 0) & (tap < kh)
    w_gather = wt[jnp.clip(tap, 0, kh - 1)]                  # (h_in, h_out, Cin, Cout)
    w_gather = jnp.where(valid[:, :, None, None], w_gather, 0.0)
    m = jnp.transpose(w_gather, (0, 2, 1, 3))                # (h_in, Cin, h_out, Cout)

    if pool == 2:
        hp = h_out // 2                                      # floor-mode pooling
        cols = jnp.concatenate([2 * jnp.arange(hp), 2 * jnp.arange(hp) + 1])
        m = m[:, :, cols, :]                                 # even positions | odd
        n_pos, h_next = 2 * hp, hp
    else:
        n_pos, h_next = h_out, h_out

    width = n_pos * cout
    m = m.reshape(h_in * cin, width)
    bias = jnp.tile(b_conv, n_pos)
    if pad_to_lane:
        padded = _round_up(width, LANE)
        if padded > width:
            m = jnp.pad(m, ((0, 0), (0, padded - width)))
            bias = jnp.pad(bias, (0, padded - width))
            width = padded
    return m.astype(dtype), bias.reshape(1, width).astype(jnp.float32), h_next, width


def pack_params(params, h, w, dtype=jnp.bfloat16):
    packed = {"convs": []}
    h_in = h
    widths = []
    n_layers = len(POOLS)
    for idx, ((w_conv, b_conv), pool) in enumerate(zip(params["convs"], POOLS)):
        m, bias_row, h_in, width = _build_conv_matrix(
            w_conv, b_conv, h_in, pool, dtype, pad_to_lane=(idx == n_layers - 1))
        packed["convs"].append((m, bias_row))
        widths.append(width)

    # Head: concat actor|critic, fold PyTorch's (C, H, W) flatten order, pad the
    # row count to 8 and the per-w feature width to the padded layer-4 width.
    wa, ba = params["actor"]          # (A, F), (A,)
    wc, bc = params["critic"]         # (1, F), (1,)
    num_actions = wa.shape[0]
    c4 = CONV_CHANNELS[-1][1]
    h4 = h_in
    f_real = h4 * c4                  # 192 at the reference shapes
    f_pad = widths[-1]                # 256 (lane-padded)
    n_out = num_actions + 1
    n_out_pad = _round_up(n_out, 8)

    whead = jnp.concatenate([wa, wc], axis=0)                # (A+1, F*W)
    whead = whead.reshape(n_out, c4, h4, w)                  # [a, c, h, wpos]
    whead = jnp.transpose(whead, (0, 3, 2, 1))               # [a, wpos, h, c]
    whead = whead.reshape(n_out, w, f_real)
    whead = jnp.pad(whead, ((0, n_out_pad - n_out), (0, 0), (0, f_pad - f_real)))
    packed["head_w"] = whead.reshape(n_out_pad, w * f_pad).astype(dtype)

    bh = jnp.concatenate([ba, bc])
    bh = jnp.pad(bh, (0, n_out_pad - n_out))
    packed["head_b"] = bh.reshape(1, n_out_pad).astype(jnp.float32)
    return packed


# ---------------------------------------------------------------------------
# Forward pass (single fused pallas_call).
# ---------------------------------------------------------------------------
@functools.partial(jax.jit, static_argnames=("num_actions",))
def dnn_forward(x_nchw, packed, num_actions):
    B, C, H, W = x_nchw.shape
    # NCHW -> (W*B, H*C): row n = w*B + b, col = h*C + c.
    # TODO(synk): fold this relayout into the kernel (needs an in-kernel
    # sublane->lane transpose of a tiny (C*H, W) slab); kept host-side for
    # lowering safety.
    x2d = jnp.transpose(x_nchw, (3, 0, 2, 1)).reshape(W * B, H * C)

    (m1, b1), (m2, b2), (m3, b3), (m4, b4) = packed["convs"]
    wh, bh = packed["head_w"], packed["head_b"]

    kernel = functools.partial(fused_dnn_kernel, w_dim=W, b_dim=B, pools=POOLS)
    vmem = pl.BlockSpec(memory_space=pltpu.MemorySpace.VMEM)
    logits, value = pl.pallas_call(
        kernel,
        out_shape=(jax.ShapeDtypeStruct((B, num_actions), jnp.float32),
                   jax.ShapeDtypeStruct((B, 1), jnp.float32)),
        in_specs=[vmem] * 11,
        out_specs=(vmem, vmem),
    )(x2d, m1, b1, m2, b2, m3, b3, m4, b4, wh, bh)
    return logits, value


# ---------------------------------------------------------------------------
# Pure-JAX reference (XLA conv) for correctness checking.
# ---------------------------------------------------------------------------
def dnn_forward_reference(x, params):
    act = x
    for (w_conv, b_conv), pool in zip(params["convs"], POOLS):
        act = lax.conv_general_dilated(
            act, w_conv, window_strides=(1, 1), padding=((PAD, PAD), (0, 0)),
            dimension_numbers=("NCHW", "OIHW", "NCHW"),
            precision=lax.Precision.HIGHEST)
        act = jnp.maximum(act + b_conv[None, :, None, None], 0.0)
        if pool == 2:
            b_, c_, h_, w_ = act.shape
            hp = h_ // 2
            act = jnp.max(act[:, :, :2 * hp, :].reshape(b_, c_, hp, 2, w_), axis=3)
    feats = act.reshape(act.shape[0], -1)
    wa, ba = params["actor"]
    wc, bc = params["critic"]
    return feats @ wa.T + ba, feats @ wc.T + bc


# ---------------------------------------------------------------------------
# Deterministic init (kaiming-normal weights, zero biases) in PyTorch layout.
# ---------------------------------------------------------------------------
def init_params(key, h, w, num_actions):
    convs = []
    for cin, cout in CONV_CHANNELS:
        key, sub = jax.random.split(key)
        std = (2.0 / (cin * KH)) ** 0.5
        convs.append((jax.random.normal(sub, (cout, cin, KH, 1), jnp.float32) * std,
                      jnp.zeros((cout,), jnp.float32)))

    # Replicate the size arithmetic of DnnModel.__init__.
    size_h = h
    for pool in POOLS:
        size_h = _conv_h_out(size_h) // pool
    feat = size_h * w * CONV_CHANNELS[-1][1]

    key, ka, kc = jax.random.split(key, 3)
    std_lin = (2.0 / feat) ** 0.5
    wa = jax.random.normal(ka, (num_actions, feat), jnp.float32) * std_lin
    wc = jax.random.normal(kc, (1, feat), jnp.float32) * std_lin
    return {"convs": convs,
            "actor": (wa, jnp.zeros((num_actions,), jnp.float32)),
            "critic": (wc, jnp.zeros((1,), jnp.float32))}


# ---------------------------------------------------------------------------
if __name__ == "__main__":
    B, C_IN, H, W = 2, 2, 16, 4          # module requires 2 input channels
    NUM_ACTIONS = 6

    key = jax.random.PRNGKey(0)
    key, kx = jax.random.split(key)
    x = jax.random.normal(kx, (B, C_IN, H, W), dtype=jnp.float32)

    params = init_params(key, H, W, NUM_ACTIONS)
    ref_logits, ref_value = dnn_forward_reference(x, params)

    # f32-packed path: validates the kernel structure (conv-as-matmul, pooling,
    # padding, head collapse) against the XLA reference.
    packed_f32 = pack_params(params, H, W, dtype=jnp.float32)
    la32, va32 = dnn_forward(x, packed_f32, NUM_ACTIONS)
    jax.block_until_ready((la32, va32))
    assert la32.shape == (B, NUM_ACTIONS) and va32.shape == (B, 1)
    err32 = max(float(jnp.max(jnp.abs(la32 - ref_logits))),
                float(jnp.max(jnp.abs(va32 - ref_value))))
    assert err32 < 1e-1, err32

    # bf16-packed path (default / production): half the weight DMA, native MXU
    # operand width; looser tolerance accounts for bf16 operand rounding.
    packed_bf16 = pack_params(params, H, W)          # dtype=bfloat16 (default)
    la16, va16 = dnn_forward(x, packed_bf16, NUM_ACTIONS)
    jax.block_until_ready((la16, va16))
    assert la16.shape == (B, NUM_ACTIONS) and va16.shape == (B, 1)
    err16 = max(float(jnp.max(jnp.abs(la16 - ref_logits))),
                float(jnp.max(jnp.abs(va16 - ref_value))))
    assert err16 < 2.5e-1, err16

    print("KERNEL_OK")
</pallas_src>

<mosaic_0001>
module attributes {stable_mosaic.version = 11 : i64} {
  func.func @fused_dnn_kernel(%arg0: memref<8x32xf32, #tpu.memory_space<vmem>>, %arg1: memref<32x512xf32, #tpu.memory_space<vmem>>, %arg2: memref<1x512xf32, #tpu.memory_space<vmem>>, %arg3: memref<256x512xf32, #tpu.memory_space<vmem>>, %arg4: memref<1x512xf32, #tpu.memory_space<vmem>>, %arg5: memref<256x256xf32, #tpu.memory_space<vmem>>, %arg6: memref<1x256xf32, #tpu.memory_space<vmem>>, %arg7: memref<128x256xf32, #tpu.memory_space<vmem>>, %arg8: memref<1x256xf32, #tpu.memory_space<vmem>>, %arg9: memref<8x1024xf32, #tpu.memory_space<vmem>>, %arg10: memref<1x8xf32, #tpu.memory_space<vmem>>, %arg11: memref<2x6xf32, #tpu.memory_space<vmem>>, %arg12: memref<2x1xf32, #tpu.memory_space<vmem>>) attributes {dimension_semantics = [], scalar_prefetch = 0 : i64, scratch_operands = 0 : i64, tpu.core_type = #tpu.core_type<tc>} {
    %c0 = arith.constant 0 : index
    %c0_0 = arith.constant 0 : index
    %0 = vector.load %arg0[%c0, %c0_0] : memref<8x32xf32, #tpu.memory_space<vmem>>, vector<8x32xf32>
    %c0_1 = arith.constant 0 : index
    %c0_2 = arith.constant 0 : index
    %1 = vector.load %arg1[%c0_1, %c0_2] : memref<32x512xf32, #tpu.memory_space<vmem>>, vector<32x512xf32>
    %cst = arith.constant dense<0.000000e+00> : vector<8x512xf32>
    %2 = tpu.matmul %0, %1, %cst {dimension_numbers = #tpu.dot_dimension_numbers<[1], [0], [0], [1], [0, 0, 1, 1], [], []>} : vector<8x32xf32>, vector<32x512xf32>, vector<8x512xf32> -> vector<8x512xf32>
    %c0_3 = arith.constant 0 : index
    %c0_4 = arith.constant 0 : index
    %3 = vector.load %arg2[%c0_3, %c0_4] : memref<1x512xf32, #tpu.memory_space<vmem>>, vector<1x512xf32>
    %4 = vector.broadcast %3 : vector<1x512xf32> to vector<8x512xf32>
    %5 = arith.addf %2, %4 : vector<8x512xf32>
    %cst_5 = arith.constant 0.000000e+00 : f32
    %6 = vector.broadcast %cst_5 : f32 to vector<8x512xf32>
    %7 = arith.maximumf %5, %6 : vector<8x512xf32>
    %8 = vector.extract_strided_slice %7 {offsets = [0, 0], sizes = [8, 256], strides = [1, 1]} : vector<8x512xf32> to vector<8x256xf32>
    %9 = vector.extract_strided_slice %7 {offsets = [0, 256], sizes = [8, 256], strides = [1, 1]} : vector<8x512xf32> to vector<8x256xf32>
    %10 = arith.maximumf %8, %9 : vector<8x256xf32>
    %c0_6 = arith.constant 0 : index
    %c0_7 = arith.constant 0 : index
    %11 = vector.load %arg3[%c0_6, %c0_7] : memref<256x512xf32, #tpu.memory_space<vmem>>, vector<256x512xf32>
    %cst_8 = arith.constant dense<0.000000e+00> : vector<8x512xf32>
    %12 = tpu.matmul %10, %11, %cst_8 {dimension_numbers = #tpu.dot_dimension_numbers<[1], [0], [0], [1], [0, 0, 1, 1], [], []>} : vector<8x256xf32>, vector<256x512xf32>, vector<8x512xf32> -> vector<8x512xf32>
    %c0_9 = arith.constant 0 : index
    %c0_10 = arith.constant 0 : index
    %13 = vector.load %arg4[%c0_9, %c0_10] : memref<1x512xf32, #tpu.memory_space<vmem>>, vector<1x512xf32>
    %14 = vector.broadcast %13 : vector<1x512xf32> to vector<8x512xf32>
    %15 = arith.addf %12, %14 : vector<8x512xf32>
    %cst_11 = arith.constant 0.000000e+00 : f32
    %16 = vector.broadcast %cst_11 : f32 to vector<8x512xf32>
    %17 = arith.maximumf %15, %16 : vector<8x512xf32>
    %18 = vector.extract_strided_slice %17 {offsets = [0, 0], sizes = [8, 256], strides = [1, 1]} : vector<8x512xf32> to vector<8x256xf32>
    %19 = vector.extract_strided_slice %17 {offsets = [0, 256], sizes = [8, 256], strides = [1, 1]} : vector<8x512xf32> to vector<8x256xf32>
    %20 = arith.maximumf %18, %19 : vector<8x256xf32>
    %c0_12 = arith.constant 0 : index
    %c0_13 = arith.constant 0 : index
    %21 = vector.load %arg5[%c0_12, %c0_13] : memref<256x256xf32, #tpu.memory_space<vmem>>, vector<256x256xf32>
    %cst_14 = arith.constant dense<0.000000e+00> : vector<8x256xf32>
    %22 = tpu.matmul %20, %21, %cst_14 {dimension_numbers = #tpu.dot_dimension_numbers<[1], [0], [0], [1], [0, 0, 1, 1], [], []>} : vector<8x256xf32>, vector<256x256xf32>, vector<8x256xf32> -> vector<8x256xf32>
    %c0_15 = arith.constant 0 : index
    %c0_16 = arith.constant 0 : index
    %23 = vector.load %arg6[%c0_15, %c0_16] : memref<1x256xf32, #tpu.memory_space<vmem>>, vector<1x256xf32>
    %24 = vector.broadcast %23 : vector<1x256xf32> to vector<8x256xf32>
    %25 = arith.addf %22, %24 : vector<8x256xf32>
    %cst_17 = arith.constant 0.000000e+00 : f32
    %26 = vector.broadcast %cst_17 : f32 to vector<8x256xf32>
    %27 = arith.maximumf %25, %26 : vector<8x256xf32>
    %28 = vector.extract_strided_slice %27 {offsets = [0, 0], sizes = [8, 128], strides = [1, 1]} : vector<8x256xf32> to vector<8x128xf32>
    %29 = vector.extract_strided_slice %27 {offsets = [0, 128], sizes = [8, 128], strides = [1, 1]} : vector<8x256xf32> to vector<8x128xf32>
    %30 = arith.maximumf %28, %29 : vector<8x128xf32>
    %c0_18 = arith.constant 0 : index
    %c0_19 = arith.constant 0 : index
    %31 = vector.load %arg7[%c0_18, %c0_19] : memref<128x256xf32, #tpu.memory_space<vmem>>, vector<128x256xf32>
    %cst_20 = arith.constant dense<0.000000e+00> : vector<8x256xf32>
    %32 = tpu.matmul %30, %31, %cst_20 {dimension_numbers = #tpu.dot_dimension_numbers<[1], [0], [0], [1], [0, 0, 1, 1], [], []>} : vector<8x128xf32>, vector<128x256xf32>, vector<8x256xf32> -> vector<8x256xf32>
    %c0_21 = arith.constant 0 : index
    %c0_22 = arith.constant 0 : index
    %33 = vector.load %arg8[%c0_21, %c0_22] : memref<1x256xf32, #tpu.memory_space<vmem>>, vector<1x256xf32>
    %34 = vector.broadcast %33 : vector<1x256xf32> to vector<8x256xf32>
    %35 = arith.addf %32, %34 : vector<8x256xf32>
    %cst_23 = arith.constant 0.000000e+00 : f32
    %36 = vector.broadcast %cst_23 : f32 to vector<8x256xf32>
    %37 = arith.maximumf %35, %36 : vector<8x256xf32>
    %38 = vector.extract_strided_slice %37 {offsets = [0, 0], sizes = [2, 256], strides = [1, 1]} : vector<8x256xf32> to vector<2x256xf32>
    %39 = vector.extract_strided_slice %37 {offsets = [2, 0], sizes = [2, 256], strides = [1, 1]} : vector<8x256xf32> to vector<2x256xf32>
    %40 = vector.extract_strided_slice %37 {offsets = [4, 0], sizes = [2, 256], strides = [1, 1]} : vector<8x256xf32> to vector<2x256xf32>
    %41 = vector.extract_strided_slice %37 {offsets = [6, 0], sizes = [2, 256], strides = [1, 1]} : vector<8x256xf32> to vector<2x256xf32>
    %42 = tpu.concatenate %38, %39, %40, %41 in 1 : vector<2x256xf32>, vector<2x256xf32>, vector<2x256xf32>, vector<2x256xf32> -> vector<2x1024xf32>
    %c0_24 = arith.constant 0 : index
    %c0_25 = arith.constant 0 : index
    %43 = vector.load %arg9[%c0_24, %c0_25] : memref<8x1024xf32, #tpu.memory_space<vmem>>, vector<8x1024xf32>
    %cst_26 = arith.constant dense<0.000000e+00> : vector<2x8xf32>
    %44 = tpu.matmul %42, %43, %cst_26 {dimension_numbers = #tpu.dot_dimension_numbers<[1], [1], [0], [0], [0, 0, 1, 0], [], []>} : vector<2x1024xf32>, vector<8x1024xf32>, vector<2x8xf32> -> vector<2x8xf32>
    %c0_27 = arith.constant 0 : index
    %c0_28 = arith.constant 0 : index
    %45 = vector.load %arg10[%c0_27, %c0_28] : memref<1x8xf32, #tpu.memory_space<vmem>>, vector<1x8xf32>
    %46 = vector.broadcast %45 : vector<1x8xf32> to vector<2x8xf32>
    %47 = arith.addf %44, %46 : vector<2x8xf32>
    %48 = vector.extract_strided_slice %47 {offsets = [0, 0], sizes = [2, 6], strides = [1, 1]} : vector<2x8xf32> to vector<2x6xf32>
    %c0_29 = arith.constant 0 : index
    %c0_30 = arith.constant 0 : index
    %49 = vector.load %arg11[%c0_29, %c0_30] : memref<2x6xf32, #tpu.memory_space<vmem>>, vector<2x6xf32>
    tpu.vector_store %arg11[%c0_29, %c0_30], %48 {strides = array<i32>} : memref<2x6xf32, #tpu.memory_space<vmem>>, vector<2x6xf32>,
    %50 = vector.extract_strided_slice %47 {offsets = [0, 6], sizes = [2, 1], strides = [1, 1]} : vector<2x8xf32> to vector<2x1xf32>
    %c0_31 = arith.constant 0 : index
    %c0_32 = arith.constant 0 : index
    %51 = vector.load %arg12[%c0_31, %c0_32] : memref<2x1xf32, #tpu.memory_space<vmem>>, vector<2x1xf32>
    tpu.vector_store %arg12[%c0_31, %c0_32], %50 {strides = array<i32>} : memref<2x1xf32, #tpu.memory_space<vmem>>, vector<2x1xf32>,
    return
  }
}

</mosaic_0001>

<bundles_post_ra>
// kernel: dnn_forward.1
= control target key start
LH: loop header
LB: loop body
LE: loop exit
PB: predicated region body
PF: predicated region fallthrough
CT: control target
= control target key end

     0   :  { %18 = vsyncpa [#allocation3], 0  ;;  %s2022_s0 = inlined_call_operand.vmem [shape: f32[8,32], index: 0, kind: input, shape index: {}]   ;;  %s2023_s1 = inlined_call_operand.hbm [shape: f32[32,512], index: 1, kind: input, shape index: {}]   ;;  %s2024_s2 = inlined_call_operand.hbm [shape: f32[1,512], index: 2, kind: input, shape index: {}]   ;;  %s2025_s3 = inlined_call_operand.hbm [shape: f32[256,512], index: 3, kind: input, shape index: {}]   ;;  %s2026_s4 = inlined_call_operand.hbm [shape: f32[1,512], index: 4, kind: input, shape index: {}]   ;;  %s2027_s5 = inlined_call_operand.hbm [shape: f32[256,256], index: 5, kind: input, shape index: {}]   ;;  %s2028_s6 = inlined_call_operand.hbm [shape: f32[1,256], index: 6, kind: input, shape index: {}]   ;;  %s2029_s7 = inlined_call_operand.vmem [shape: f32[128,256], index: 7, kind: input, shape index: {}]   ;;  %s2030_s8 = inlined_call_operand.hbm [shape: f32[1,256], index: 8, kind: input, shape index: {}]   ;;  %s2031_s9 = inlined_call_operand.vmem [shape: f32[8,1024], index: 9, kind: input, shape index: {}]   ;;  %s2032_s10 = inlined_call_operand.vmem [shape: f32[1,8], index: 10, kind: input, shape index: {}]   ;;  %s2033_s11 = inlined_call_operand.hbm [shape: f32[2,6], index: 11, kind: output, shape index: {0}]   ;;  %s2034_s12 = inlined_call_operand.vmem [shape: f32[2,1], index: 12, kind: output, shape index: {1}]  }
   0x1   :  { %19 = vsyncpa [#allocation6], 0 }
   0x2   :  { %20 = vsyncpa [#allocation9], 0 }
   0x3   :  { %21 = vsyncpa [#allocation12], 0 }
   0x4   :  { %22 = vsyncpa [#allocation4], 0  ;;  %s1673_s21 = smov [#allocation5]   ;;  %s1674_s23 = smov [#allocation8]  }
   0x5   :  { %s43_s22 = sshll.u32 %s1673_s21, 4  ;;  %s65_s24 = sshll.u32 %s1674_s23, 4  ;;  %s44_s22 = int_to_ptr.vmem [resolvable:$true] %s43_s22  ;;  %s66_s24 = int_to_ptr.vmem [resolvable:$true] %s65_s24 }
   0x6   :  { %s1487_s27 = scalar_lea.hbm %s2024_s2, 64 }
   0x7   :  { %p1488_p0 = scmp.ne.s32.totalorder %s2024_s2, %s1487_s27  ;;  %p1491_p1 = scmp.lt.u32.totalorder %s1487_s27, %s2024_s2 }
   0x9   :  { %p1493_p2 = pnand %p1491_p1, %p1488_p0 }
   0xb   :  { %1496 = shalt.err (!%p1493_p2)
}
   0xc   :  { %s1497_s14 = scalar_lea.vmem %s44_s22, 64  ;;  %p1502_p4 = scmp.lt.s32.totalorder %s44_s22, %s44_s22 }
   0xd   :  { %p1498_p3 = scmp.ne.s32.totalorder %s44_s22, %s1497_s14  ;;  %p1503_p5 = scmp.lt.s32.totalorder %s1497_s14, %s1497_s14 }
   0xf   :  { %p1504_p6 = por %p1503_p5, %p1502_p4 }
  0x11   :  { %p1505_p7 = pnand %p1504_p6, %p1498_p3 }
  0x13   :  { %1508 = shalt.err (!%p1505_p7)
}
  0x14   :  { %46 = dma.hbm_to_vmem [thread:$0]  %s2024_s2, 64, %s44_s22, [#allocation6]  }
  0x15   :  { %s1509_s19 = scalar_lea.hbm %s2026_s4, 64 }
  0x16   :  { %p1510_p8 = scmp.ne.s32.totalorder %s2026_s4, %s1509_s19  ;;  %p1513_p9 = scmp.lt.u32.totalorder %s1509_s19, %s2026_s4 }
  0x18   :  { %p1515_p10 = pnand %p1513_p9, %p1510_p8 }
  0x1a   :  { %1518 = shalt.err (!%p1515_p10)
}
  0x1b   :  { %s1519_s26 = scalar_lea.vmem %s66_s24, 64  ;;  %p1524_p12 = scmp.lt.s32.totalorder %s66_s24, %s66_s24 }
  0x1c   :  { %p1520_p11 = scmp.ne.s32.totalorder %s66_s24, %s1519_s26  ;;  %p1525_p13 = scmp.lt.s32.totalorder %s1519_s26, %s1519_s26 }
  0x1e   :  { %p1526_p0 = por %p1525_p13, %p1524_p12 }
  0x20   :  { %p1527_p1 = pnand %p1526_p0, %p1520_p11 }
  0x22   :  { %1530 = shalt.err (!%p1527_p1)
}
  0x23   :  { %68 = dma.hbm_to_vmem [thread:$0]  %s2026_s4, 64, %s66_s24, [#allocation9]  }
  0x24   :  { %s1675_s27 = smov [#allocation11]   ;;  %s1676_s29 = smov [#allocation2]  }
  0x25   :  { %s87_s28 = sshll.u32 %s1675_s27, 4  ;;  %s30_s30 = sshll.u32 %s1676_s29, 4  ;;  %s88_s28 = int_to_ptr.vmem [resolvable:$true] %s87_s28  ;;  %s1776_s30 = int_to_ptr.vmem [resolvable:$true] %s30_s30 }
  0x26   :  { %s1531_s15 = scalar_lea.hbm %s2028_s6, 32 }
  0x27   :  { %p1532_p2 = scmp.ne.s32.totalorder %s2028_s6, %s1531_s15  ;;  %p1535_p3 = scmp.lt.u32.totalorder %s1531_s15, %s2028_s6 }
  0x29   :  { %p1537_p4 = pnand %p1535_p3, %p1532_p2 }
  0x2b   :  { %1540 = shalt.err (!%p1537_p4)
}
  0x2c   :  { %s1541_s4 = scalar_lea.vmem %s88_s28, 32  ;;  %p1546_p6 = scmp.lt.s32.totalorder %s88_s28, %s88_s28 }
  0x2d   :  { %p1542_p5 = scmp.ne.s32.totalorder %s88_s28, %s1541_s4  ;;  %p1547_p7 = scmp.lt.s32.totalorder %s1541_s4, %s1541_s4 }
  0x2f   :  { %p1548_p8 = por %p1547_p7, %p1546_p6 }
  0x31   :  { %p1549_p9 = pnand %p1548_p8, %p1542_p5 }
  0x33   :  { %1552 = shalt.err (!%p1549_p9)
}
  0x34   :  { %90 = dma.hbm_to_vmem [thread:$0]  %s2028_s6, 32, %s88_s28, [#allocation12]  }
  0x35   :  { %s1553_s25 = scalar_lea.hbm %s2023_s1, 2048 }
  0x36   :  { %p1554_p10 = scmp.ne.s32.totalorder %s2023_s1, %s1553_s25  ;;  %p1557_p11 = scmp.lt.u32.totalorder %s1553_s25, %s2023_s1 }
  0x38   :  { %p1559_p12 = pnand %p1557_p11, %p1554_p10 }
  0x3a   :  { %1562 = shalt.err (!%p1559_p12)
}
  0x3b   :  { %s1563_s29 = scalar_lea.vmem %s1776_s30, 2048  ;;  %p1568_p0 = scmp.lt.s32.totalorder %s1776_s30, %s1776_s30 }
  0x3c   :  { %p1564_p13 = scmp.ne.s32.totalorder %s1776_s30, %s1563_s29  ;;  %p1569_p1 = scmp.lt.s32.totalorder %s1563_s29, %s1563_s29 }
  0x3e   :  { %p1570_p2 = por %p1569_p1, %p1568_p0 }
  0x40   :  { %p1571_p3 = pnand %p1570_p2, %p1564_p13 }
  0x42   :  { %1574 = shalt.err (!%p1571_p3)
}
  0x43   :  { %s1677_s6 = smov 512   ;;  %s1678_s28 = smov 32  }
  0x44   :  { %36 = dma.hbm_to_vmem [thread:$0]  %s2023_s1, 2048, %s1776_s30, [#allocation3], %s1677_s6, %s1677_s6, %s1678_s28  }
  0x45   :  { %s1679_s15 = smov [#allocation7]   ;;  %s1680_s17 = smov [#allocation10]  }
  0x46   :  { %s52_s16 = sshll.u32 %s1679_s15, 4  ;;  %s74_s18 = sshll.u32 %s1680_s17, 4  ;;  %s53_s16 = int_to_ptr.vmem [resolvable:$true] %s52_s16  ;;  %s1807_s18 = int_to_ptr.vmem [resolvable:$true] %s74_s18 }
  0x47   :  { %s1575_s24 = scalar_lea.hbm %s2025_s3, 16384 }
  0x48   :  { %p1576_p4 = scmp.ne.s32.totalorder %s2025_s3, %s1575_s24  ;;  %p1579_p5 = scmp.lt.u32.totalorder %s1575_s24, %s2025_s3 }
  0x4a   :  { %p1581_p6 = pnand %p1579_p5, %p1576_p4 }
  0x4c   :  { %1584 = shalt.err (!%p1581_p6)
}
  0x4d   :  { %s1585_s1 = scalar_lea.vmem %s53_s16, 16384  ;;  %p1590_p8 = scmp.lt.s32.totalorder %s53_s16, %s53_s16 }
  0x4e   :  { %p1586_p7 = scmp.ne.s32.totalorder %s53_s16, %s1585_s1  ;;  %p1591_p9 = scmp.lt.s32.totalorder %s1585_s1, %s1585_s1 }
  0x50   :  { %p1592_p10 = por %p1591_p9, %p1590_p8 }
  0x52   :  { %p1593_p11 = pnand %p1592_p10, %p1586_p7 }
  0x54   :  { %1596 = shalt.err (!%p1593_p11)
}
  0x55   :  { %58 = dma.hbm_to_vmem [thread:$0]  %s2025_s3, 16384, %s53_s16, [#allocation6], %s1677_s6, %s1677_s6, %s1678_s28  }
  0x56   :  { %s1597_s27 = scalar_lea.hbm %s2027_s5, 8192 }
  0x57   :  { %p1598_p12 = scmp.ne.s32.totalorder %s2027_s5, %s1597_s27  ;;  %p1601_p13 = scmp.lt.u32.totalorder %s1597_s27, %s2027_s5 }
  0x59   :  { %p1603_p0 = pnand %p1601_p13, %p1598_p12 }
  0x5b   :  { %1606 = shalt.err (!%p1603_p0)
}
  0x5c   :  { %s1607_s17 = scalar_lea.vmem %s1807_s18, 8192  ;;  %p1612_p2 = scmp.lt.s32.totalorder %s1807_s18, %s1807_s18 }
  0x5d   :  { %p1608_p1 = scmp.ne.s32.totalorder %s1807_s18, %s1607_s17  ;;  %p1613_p3 = scmp.lt.s32.totalorder %s1607_s17, %s1607_s17 }
  0x5f   :  { %p1614_p4 = por %p1613_p3, %p1612_p2 }
  0x61   :  { %p1615_p5 = pnand %p1614_p4, %p1608_p1 }
  0x63   :  { %1618 = shalt.err (!%p1615_p5)
}
  0x64   :  { %s1681_s3 = smov 256   ;;  %s1682_s6 = smov 16  }
  0x65   :  { %80 = dma.hbm_to_vmem [thread:$0]  %s2027_s5, 8192, %s1807_s18, [#allocation9], %s1681_s3, %s1681_s3, %s1682_s6  }
  0x66   :  { %s1683_s19 = smov [#allocation13]   ;;  %s1619_s21 = scalar_lea.hbm %s2030_s8, 32 }
  0x67   :  { %s99_s4 = sshll.u32 %s1683_s19, 4  ;;  %p1620_p6 = scmp.ne.s32.totalorder %s2030_s8, %s1619_s21  ;;  %s100_s4 = int_to_ptr.vmem [resolvable:$true] %s99_s4 }
  0x68   :  { %p1623_p7 = scmp.lt.u32.totalorder %s1619_s21, %s2030_s8 }
  0x6a   :  { %p1625_p8 = pnand %p1623_p7, %p1620_p6 }
  0x6c   :  { %1628 = shalt.err (!%p1625_p8)
}
  0x6d   :  { %s1629_s26 = scalar_lea.vmem %s100_s4, 32  ;;  %p1634_p10 = scmp.lt.s32.totalorder %s100_s4, %s100_s4 }
  0x6e   :  { %p1630_p9 = scmp.ne.s32.totalorder %s100_s4, %s1629_s26  ;;  %p1635_p11 = scmp.lt.s32.totalorder %s1629_s26, %s1629_s26 }
  0x70   :  { %p1636_p12 = por %p1635_p11, %p1634_p10 }
  0x72   :  { %p1637_p13 = pnand %p1636_p12, %p1630_p9 }
  0x74   :  { %1640 = shalt.err (!%p1637_p13)
}
  0x75   :  { %102 = dma.hbm_to_vmem [thread:$0]  %s2030_s8, 32, %s100_s4, [#allocation12]  }
  0x76   :  { %1663 = dma.done.wait [#allocation3], 2048  }
  0x77   :  { %1664 = vsyncadd [#allocation3], 4294965248 }
  0x78   :  { %1665 = dma.done.wait [#allocation6], 16448  }
  0x79   :  { %1666 = vsyncadd [#allocation6], 4294950848 }
  0x7a   :  { %1667 = dma.done.wait [#allocation9], 8256  }
  0x7b   :  { %1668 = vsyncadd [#allocation9], 4294959040 }
  0x7c   :  { %1669 = dma.done.wait [#allocation12], 64  }
  0x7d   :  { %1670 = vsyncadd [#allocation12], 4294967232  ;;  %v1684_v0 = vmov 0.0   ;;  %v130_v1 = vld [vmem:[#allocation2 + $0x8] sm:$0xff]  ;;  %v129_v3 = vld [vmem:[#allocation2] sm:$0xff]  ;;  %vm167_vm0 = vcmask 261120  }
  0x7e   :  { %235 = vmatprep.mubr.f32.mxu1 %v1684_v0  ;;  %v134_v2 = vld [vmem:[#allocation2 + $0x28] sm:$0xff]  ;;  %v133_v5 = vld [vmem:[#allocation2 + $0x20] sm:$0xff]  ;;  %v132_v12 = vld [vmem:[#allocation2 + $0x18] sm:$0xff]  ;;  %s1685_s29 = smov [#allocation14]   ;;  %vm1193_vm1 = vcmask 41984   ;;  %s1686_s14 = smov 122  }
  0x7f   :  { %v1226_v4 = vpack.c.bf16 %v134_v2, %v130_v1  ;;  %v138_v6 = vld [vmem:[#allocation2 + $0x48] sm:$0xff]  ;;  %v1228_v8 = vpack.c.bf16 %v133_v5, %v129_v3  ;;  %v137_v10 = vld [vmem:[#allocation2 + $0x40] sm:$0xff]  ;;  %v136_v13 = vld [vmem:[#allocation2 + $0x38] sm:$0xff]  ;;  %s1207_s13 = sshll.u32 %s1685_s29, 4  ;;  %s1208_s13 = int_to_ptr.vmem [resolvable:$true] %s1207_s13 }
  0x80   :  { %v142_v7 = vld [vmem:[#allocation2 + $0x68] sm:$0xff]  ;;  %v141_v11 = vld [vmem:[#allocation2 + $0x60] sm:$0xff]  ;;  %v1234_v15 = vpack.c.bf16 %v136_v13, %v132_v12  ;;  %v131_v16 = vld [vmem:[#allocation2 + $0x10] sm:$0xff]  ;;  %p1646_p1 = scmp.lt.s32.totalorder %s1208_s13, %s1208_s13 }
  0x81   :  { %v1230_v9 = vpack.c.bf16 %v142_v7, %v138_v6  ;;  %1227 = vmatprep.subr.bf16.mxu1 %v1226_v4  ;;  %v1232_v14 = vpack.c.bf16 %v141_v11, %v137_v10  ;;  %v135_v17 = vld [vmem:[#allocation2 + $0x30] sm:$0xff]  ;;  %v140_v19 = vld [vmem:[#allocation2 + $0x58] sm:$0xff]  ;;  %v319_v23 = vld [vmem:[#allocation7] sm:$0xff] }
  0x82   :  { %1229 = vmatpush1.bf16.msra.mxu1 %v1228_v8  ;;  %v320_v18 = vld [vmem:[#allocation7 + $0x8] sm:$0xff]  ;;  %v144_v20 = vld [vmem:[#allocation2 + $0x78] sm:$0xff]  ;;  %v323_v24 = vld [vmem:[#allocation7 + $0x20] sm:$0xff]  ;;  %v1236_v26 = vpack.c.bf16 %v135_v17, %v131_v16 }
  0x83   :  { %1231 = vmatprep.subr.bf16.mxu1 %v1230_v9  ;;  %v324_v21 = vld [vmem:[#allocation7 + $0x28] sm:$0xff]  ;;  %v128_v25 = vld [vmem:[%s2022_s0] sm:$0xff]  ;;  %v1244_v27 = vpack.c.bf16 %v323_v24, %v319_v23  ;;  %v1238_v30 = vpack.c.bf16 %v144_v20, %v140_v19  ;;  %v321_v46 = vld [vmem:[#allocation7 + $0x10] sm:$0xff] }
  0x84   :  { %v1242_v22 = vpack.c.bf16 %v324_v21, %v320_v18  ;;  %v328_v28 = vld [vmem:[#allocation7 + $0x48] sm:$0xff]  ;;  %v327_v34 = vld [vmem:[#allocation7 + $0x40] sm:$0xff]  ;;  %v322_v35 = vld [vmem:[#allocation7 + $0x18] sm:$0xff] }
  0x85   :  { %v332_v29 = vld [vmem:[#allocation7 + $0x68] sm:$0xff]  ;;  %v326_v36 = vld [vmem:[#allocation7 + $0x38] sm:$0xff]  ;;  %v331_v37 = vld [vmem:[#allocation7 + $0x60] sm:$0xff] }
  0x86   :  { %1233 = vmatpush1.bf16.msra.mxu1 %v1232_v14  ;;  %v139_v31 = vld [vmem:[#allocation2 + $0x50] sm:$0xff]  ;;  %1243 = vmatprep.subr.bf16.mxu0 %v1242_v22  ;;  %v1246_v33 = vpack.c.bf16 %v332_v29, %v328_v28  ;;  %v1248_v38 = vpack.c.bf16 %v331_v37, %v327_v34  ;;  %v335_v43 = vld [vmem:[#allocation7 + $0x80] sm:$0xff]  ;;  %v1306_v45 = vpack.c.bf16 %v326_v36, %v322_v35  ;;  %v330_v49 = vld [vmem:[#allocation7 + $0x58] sm:$0xff] }
  0x87   :  { %1235 = vmatprep.subr.bf16.mxu1 %v1234_v15  ;;  %v143_v32 = vld [vmem:[#allocation2 + $0x70] sm:$0xff]  ;;  %1245 = vmatpush1.bf16.msra.mxu0 %v1244_v27  ;;  %v339_v44 = vld [vmem:[#allocation7 + $0xa0] sm:$0xff]  ;;  %v334_v50 = vld [vmem:[#allocation7 + $0x78] sm:$0xff] }
  0x88   :  { %1247 = vmatprep.subr.bf16.mxu0 %v1246_v33  ;;  %v336_v39 = vld [vmem:[#allocation7 + $0x88] sm:$0xff]  ;;  %v1240_v41 = vpack.c.bf16 %v143_v32, %v139_v31  ;;  %v325_v47 = vld [vmem:[#allocation7 + $0x30] sm:$0xff]  ;;  %v1252_v51 = vpack.c.bf16 %v339_v44, %v335_v43  ;;  %v343_v54 = vld [vmem:[#allocation7 + $0xc0] sm:$0xff]  ;;  %v1310_v59 = vpack.c.bf16 %v334_v50, %v330_v49 }
  0x89   :  { %1223 = vmatmul.mubr.msk.f32.vlgmr.msra.gmra.mrb[0].mxu1 %vm167_vm0, %v128_v25  ;;  %v340_v40 = vld [vmem:[#allocation7 + $0xa8] sm:$0xff]  ;;  %v347_v55 = vld [vmem:[#allocation7 + $0xe0] sm:$0xff]  ;;  %v1308_v56 = vpack.c.bf16 %v325_v47, %v321_v46  ;;  %v329_v60 = vld [vmem:[#allocation7 + $0x50] sm:$0xff] }
  0x8a   :  { %1237 = vmatpush1.bf16.msra.mxu1 %v1236_v26  ;;  %306 = vmatprep.mubr.f32.mxu1 %v1684_v0  ;;  %v1250_v42 = vpack.c.bf16 %v340_v40, %v336_v39  ;;  %v344_v48 = vld [vmem:[#allocation7 + $0xc8] sm:$0xff]  ;;  %v333_v61 = vld [vmem:[#allocation7 + $0x70] sm:$0xff]  ;;  %v338_v62 = vld [vmem:[#allocation7 + $0x98] sm:$0xff]  ;;  %v1256_v1 = vpack.c.bf16 %v347_v55, %v343_v54 }
  0x8b   :  { %1239 = vmatprep.subr.bf16.mxu1 %v1238_v30  ;;  %1249 = vmatpush1.bf16.msra.mxu0 %v1248_v38  ;;  %v348_v52 = vld [vmem:[#allocation7 + $0xe8] sm:$0xff]  ;;  %v342_v63 = vld [vmem:[#allocation7 + $0xb8] sm:$0xff]  ;;  %v351_v3 = vld [vmem:[#allocation7 + $0x100] sm:$0xff]  ;;  %v1312_v5 = vpack.c.bf16 %v333_v61, %v329_v60 }
  0x8c   :  { %1251 = vmatprep.subr.bf16.mxu0 %v1250_v42  ;;  %v1254_v53 = vpack.c.bf16 %v348_v52, %v344_v48  ;;  %v352_v57 = vld [vmem:[#allocation7 + $0x108] sm:$0xff]  ;;  %v355_v4 = vld [vmem:[#allocation7 + $0x120] sm:$0xff]  ;;  %v1314_v8 = vpack.c.bf16 %v342_v63, %v338_v62  ;;  %v337_v9 = vld [vmem:[#allocation7 + $0x90] sm:$0xff] }
  0x8d   :  { %v356_v58 = vld [vmem:[#allocation7 + $0x128] sm:$0xff]  ;;  %v341_v10 = vld [vmem:[#allocation7 + $0xb0] sm:$0xff]  ;;  %v346_v11 = vld [vmem:[#allocation7 + $0xd8] sm:$0xff]  ;;  %v1260_v13 = vpack.c.bf16 %v355_v4, %v351_v3 }
  0x8e   :  { %1241 = vmatpush1.bf16.msra.mxu1 %v1240_v41  ;;  %v1258_v2 = vpack.c.bf16 %v356_v58, %v352_v57  ;;  %v360_v6 = vld [vmem:[#allocation7 + $0x148] sm:$0xff]  ;;  %v350_v12 = vld [vmem:[#allocation7 + $0xf8] sm:$0xff]  ;;  %v359_v15 = vld [vmem:[#allocation7 + $0x140] sm:$0xff]  ;;  %v1316_v17 = vpack.c.bf16 %v341_v10, %v337_v9 }
  0x8f   :  { %1307 = vmatprep.subr.bf16.mxu1 %v1306_v45  ;;  %1253 = vmatpush1.bf16.msra.mxu0 %v1252_v51  ;;  %v364_v7 = vld [vmem:[#allocation7 + $0x168] sm:$0xff]  ;;  %v363_v16 = vld [vmem:[#allocation7 + $0x160] sm:$0xff]  ;;  %v1318_v20 = vpack.c.bf16 %v350_v12, %v346_v11  ;;  %v345_v21 = vld [vmem:[#allocation7 + $0xd0] sm:$0xff] }
  0x90   :  { %1255 = vmatprep.subr.bf16.mxu0 %v1254_v53  ;;  %v1262_v14 = vpack.c.bf16 %v364_v7, %v360_v6  ;;  %v368_v18 = vld [vmem:[#allocation7 + $0x188] sm:$0xff]  ;;  %v349_v22 = vld [vmem:[#allocation7 + $0xf0] sm:$0xff]  ;;  %v354_v23 = vld [vmem:[#allocation7 + $0x118] sm:$0xff] }
  0x91   :  { %1224 = vmatmul.mubr.msk.f32.vlgmr.msra.gmra.mrb[2].mxu1 %vm167_vm0, %v128_v25  ;;  %v372_v19 = vld [vmem:[#allocation7 + $0x1a8] sm:$0xff]  ;;  %v358_v24 = vld [vmem:[#allocation7 + $0x138] sm:$0xff]  ;;  %v1264_v25 = vpack.c.bf16 %v363_v16, %v359_v15  ;;  %v367_v27 = vld [vmem:[#allocation7 + $0x180] sm:$0xff]  ;;  %v1320_v29 = vpack.c.bf16 %v349_v22, %v345_v21 }
  0x92   :  { %1309 = vmatpush1.bf16.msra.mxu1 %v1308_v56  ;;  %v1266_v26 = vpack.c.bf16 %v372_v19, %v368_v18  ;;  %v371_v28 = vld [vmem:[#allocation7 + $0x1a0] sm:$0xff]  ;;  %v376_v30 = vld [vmem:[#allocation7 + $0x1c8] sm:$0xff]  ;;  %v1322_v32 = vpack.c.bf16 %v358_v24, %v354_v23  ;;  %v353_v33 = vld [vmem:[#allocation7 + $0x110] sm:$0xff] }
  0x93   :  { %1311 = vmatprep.subr.bf16.mxu1 %v1310_v59  ;;  %1257 = vmatpush1.bf16.msra.mxu0 %v1256_v1  ;;  %v380_v31 = vld [vmem:[#allocation7 + $0x1e8] sm:$0xff]  ;;  %v357_v34 = vld [vmem:[#allocation7 + $0x130] sm:$0xff]  ;;  %v362_v35 = vld [vmem:[#allocation7 + $0x158] sm:$0xff]  ;;  %v1268_v37 = vpack.c.bf16 %v371_v28, %v367_v27 }
  0x94   :  { %1259 = vmatprep.subr.bf16.mxu0 %v1258_v2  ;;  %v366_v36 = vld [vmem:[#allocation7 + $0x178] sm:$0xff]  ;;  %v1270_v38 = vpack.c.bf16 %v380_v31, %v376_v30  ;;  %v375_v39 = vld [vmem:[#allocation7 + $0x1c0] sm:$0xff]  ;;  %v1324_v41 = vpack.c.bf16 %v357_v34, %v353_v33  ;;  %v384_v42 = vld [vmem:[#allocation7 + $0x208] sm:$0xff] }
  0x95   :  { %v379_v40 = vld [vmem:[#allocation7 + $0x1e0] sm:$0xff]  ;;  %v388_v43 = vld [vmem:[#allocation7 + $0x228] sm:$0xff]  ;;  %v1326_v44 = vpack.c.bf16 %v366_v36, %v362_v35  ;;  %v361_v45 = vld [vmem:[#allocation7 + $0x150] sm:$0xff] }
  0x96   :  { %1313 = vmatpush1.bf16.msra.mxu1 %v1312_v5  ;;  %v365_v46 = vld [vmem:[#allocation7 + $0x170] sm:$0xff]  ;;  %v370_v47 = vld [vmem:[#allocation7 + $0x198] sm:$0xff]  ;;  %v1272_v49 = vpack.c.bf16 %v379_v40, %v375_v39  ;;  %v1274_v50 = vpack.c.bf16 %v388_v43, %v384_v42  ;;  %v383_v51 = vld [vmem:[#allocation7 + $0x200] sm:$0xff] }
  0x97   :  { %1315 = vmatprep.subr.bf16.mxu1 %v1314_v8  ;;  %1261 = vmatpush1.bf16.msra.mxu0 %v1260_v13  ;;  %v374_v48 = vld [vmem:[#allocation7 + $0x1b8] sm:$0xff]  ;;  %v387_v52 = vld [vmem:[#allocation7 + $0x220] sm:$0xff]  ;;  %v1328_v53 = vpack.c.bf16 %v365_v46, %v361_v45  ;;  %v392_v54 = vld [vmem:[#allocation7 + $0x248] sm:$0xff] }
  0x98   :  { %1263 = vmatprep.subr.bf16.mxu0 %v1262_v14  ;;  %v396_v55 = vld [vmem:[#allocation7 + $0x268] sm:$0xff]  ;;  %v1330_v56 = vpack.c.bf16 %v374_v48, %v370_v47  ;;  %v369_v57 = vld [vmem:[#allocation7 + $0x190] sm:$0xff]  ;;  %v378_v59 = vld [vmem:[#allocation7 + $0x1d8] sm:$0xff]  ;;  %v1276_v61 = vpack.c.bf16 %v387_v52, %v383_v51 }
  0x99   :  { %v373_v58 = vld [vmem:[#allocation7 + $0x1b0] sm:$0xff]  ;;  %v382_v60 = vld [vmem:[#allocation7 + $0x1f8] sm:$0xff]  ;;  %v1278_v62 = vpack.c.bf16 %v396_v55, %v392_v54  ;;  %v391_v63 = vld [vmem:[#allocation7 + $0x240] sm:$0xff] }
  0x9a   :  { %1317 = vmatpush1.bf16.msra.mxu1 %v1316_v17  ;;  %v395_v1 = vld [vmem:[#allocation7 + $0x260] sm:$0xff]  ;;  %v1332_v2 = vpack.c.bf16 %v373_v58, %v369_v57  ;;  %v400_v3 = vld [vmem:[#allocation7 + $0x288] sm:$0xff]  ;;  %v1334_v5 = vpack.c.bf16 %v382_v60, %v378_v59  ;;  %v377_v6 = vld [vmem:[#allocation7 + $0x1d0] sm:$0xff] }
  0x9b   :  { %1319 = vmatprep.subr.bf16.mxu1 %v1318_v20  ;;  %1265 = vmatpush1.bf16.msra.mxu0 %v1264_v25  ;;  %v404_v4 = vld [vmem:[#allocation7 + $0x2a8] sm:$0xff]  ;;  %v381_v7 = vld [vmem:[#allocation7 + $0x1f0] sm:$0xff]  ;;  %v386_v8 = vld [vmem:[#allocation7 + $0x218] sm:$0xff]  ;;  %v1280_v10 = vpack.c.bf16 %v395_v1, %v391_v63 }
  0x9c   :  { %1267 = vmatprep.subr.bf16.mxu0 %v1266_v26  ;;  %v390_v9 = vld [vmem:[#allocation7 + $0x238] sm:$0xff]  ;;  %v1282_v11 = vpack.c.bf16 %v404_v4, %v400_v3  ;;  %v399_v12 = vld [vmem:[#allocation7 + $0x280] sm:$0xff]  ;;  %v1336_v14 = vpack.c.bf16 %v381_v7, %v377_v6  ;;  %v408_v15 = vld [vmem:[#allocation7 + $0x2c8] sm:$0xff] }
  0x9d   :  { %v403_v13 = vld [vmem:[#allocation7 + $0x2a0] sm:$0xff]  ;;  %v412_v16 = vld [vmem:[#allocation7 + $0x2e8] sm:$0xff]  ;;  %v1338_v17 = vpack.c.bf16 %v390_v9, %v386_v8  ;;  %v385_v18 = vld [vmem:[#allocation7 + $0x210] sm:$0xff] }
  0x9e   :  { %1321 = vmatpush1.bf16.msra.mxu1 %v1320_v29  ;;  %v389_v19 = vld [vmem:[#allocation7 + $0x230] sm:$0xff]  ;;  %v394_v20 = vld [vmem:[#allocation7 + $0x258] sm:$0xff]  ;;  %v1284_v22 = vpack.c.bf16 %v403_v13, %v399_v12  ;;  %v1286_v23 = vpack.c.bf16 %v412_v16, %v408_v15  ;;  %v407_v24 = vld [vmem:[#allocation7 + $0x2c0] sm:$0xff] }
  0x9f   :  { %1323 = vmatprep.subr.bf16.mxu1 %v1322_v32  ;;  %1269 = vmatpush1.bf16.msra.mxu0 %v1268_v37  ;;  %v398_v21 = vld [vmem:[#allocation7 + $0x278] sm:$0xff]  ;;  %v411_v25 = vld [vmem:[#allocation7 + $0x2e0] sm:$0xff]  ;;  %v1340_v26 = vpack.c.bf16 %v389_v19, %v385_v18  ;;  %v393_v28 = vld [vmem:[#allocation7 + $0x250] sm:$0xff] }
  0xa0   :  { %1271 = vmatprep.subr.bf16.mxu0 %v1270_v38  ;;  %v1342_v27 = vpack.c.bf16 %v398_v21, %v394_v20  ;;  %v397_v29 = vld [vmem:[#allocation7 + $0x270] sm:$0xff]  ;;  %v402_v30 = vld [vmem:[#allocation7 + $0x298] sm:$0xff]  ;;  %v1288_v32 = vpack.c.bf16 %v411_v25, %v407_v24  ;;  %v420_v45 = vld [vmem:[#allocation7 + $0x328] sm:$0xff] }
  0xa1   :  { %v406_v31 = vld [vmem:[#allocation7 + $0x2b8] sm:$0xff]  ;;  %v1344_v33 = vpack.c.bf16 %v397_v29, %v393_v28  ;;  %v401_v35 = vld [vmem:[#allocation7 + $0x290] sm:$0xff]  ;;  %v428_v57 = vld [vmem:[#allocation7 + $0x368] sm:$0xff] }
  0xa2   :  { %1325 = vmatpush1.bf16.msra.mxu1 %v1324_v41  ;;  %v1346_v34 = vpack.c.bf16 %v406_v31, %v402_v30  ;;  %v405_v36 = vld [vmem:[#allocation7 + $0x2b0] sm:$0xff]  ;;  %v410_v37 = vld [vmem:[#allocation7 + $0x2d8] sm:$0xff]  ;;  %v436_v6 = vld [vmem:[#allocation7 + $0x3a8] sm:$0xff] }
  0xa3   :  { %1327 = vmatprep.subr.bf16.mxu1 %v1326_v44  ;;  %1273 = vmatpush1.bf16.msra.mxu0 %v1272_v49  ;;  %v414_v38 = vld [vmem:[#allocation7 + $0x2f8] sm:$0xff]  ;;  %v1348_v39 = vpack.c.bf16 %v405_v36, %v401_v35  ;;  %v409_v41 = vld [vmem:[#allocation7 + $0x2d0] sm:$0xff]  ;;  %v416_v44 = vld [vmem:[#allocation7 + $0x308] sm:$0xff] }
  0xa4   :  { %1275 = vmatprep.subr.bf16.mxu0 %v1274_v50  ;;  %v1350_v40 = vpack.c.bf16 %v414_v38, %v410_v37  ;;  %v413_v42 = vld [vmem:[#allocation7 + $0x2f0] sm:$0xff]  ;;  %v418_v46 = vld [vmem:[#allocation7 + $0x318] sm:$0xff]  ;;  %v1290_v47 = vpack.c.bf16 %v420_v45, %v416_v44  ;;  %v415_v49 = vld [vmem:[#allocation7 + $0x300] sm:$0xff] }
  0xa5   :  { %v1352_v43 = vpack.c.bf16 %v413_v42, %v409_v41  ;;  %v422_v48 = vld [vmem:[#allocation7 + $0x338] sm:$0xff]  ;;  %v419_v50 = vld [vmem:[#allocation7 + $0x320] sm:$0xff]  ;;  %v421_v54 = vld [vmem:[#allocation7 + $0x330] sm:$0xff] }
  0xa6   :  { %1329 = vmatpush1.bf16.msra.mxu1 %v1328_v53  ;;  %v1354_v51 = vpack.c.bf16 %v422_v48, %v418_v46  ;;  %v1292_v52 = vpack.c.bf16 %v419_v50, %v415_v49  ;;  %v417_v53 = vld [vmem:[#allocation7 + $0x310] sm:$0xff]  ;;  %v426_v58 = vld [vmem:[#allocation7 + $0x358] sm:$0xff]  ;;  %v444_v18 = vld [vmem:[#allocation7 + $0x3e8] sm:$0xff] }
  0xa7   :  { %1331 = vmatprep.subr.bf16.mxu1 %v1330_v56  ;;  %1277 = vmatpush1.bf16.msra.mxu0 %v1276_v61  ;;  %v1356_v55 = vpack.c.bf16 %v421_v54, %v417_v53  ;;  %v424_v56 = vld [vmem:[#allocation7 + $0x348] sm:$0xff]  ;;  %v430_v60 = vld [vmem:[#allocation7 + $0x378] sm:$0xff]  ;;  %v423_v61 = vld [vmem:[#allocation7 + $0x340] sm:$0xff] }
  0xa8   :  { %1279 = vmatprep.subr.bf16.mxu0 %v1278_v62  ;;  %v1294_v59 = vpack.c.bf16 %v428_v57, %v424_v56  ;;  %v427_v62 = vld [vmem:[#allocation7 + $0x360] sm:$0xff]  ;;  %v1358_v63 = vpack.c.bf16 %v430_v60, %v426_v58  ;;  %v429_v3 = vld [vmem:[#allocation7 + $0x370] sm:$0xff]  ;;  %v434_v7 = vld [vmem:[#allocation7 + $0x398] sm:$0xff] }
  0xa9   :  { %v1296_v1 = vpack.c.bf16 %v427_v62, %v423_v61  ;;  %v438_v9 = vld [vmem:[#allocation7 + $0x3b8] sm:$0xff]  ;;  %v437_v15 = vld [vmem:[#allocation7 + $0x3b0] sm:$0xff]  ;;  %v617_v53 = vld [vmem:[#allocation10] sm:$0xff] }
  0xaa   :  { %1333 = vmatpush1.bf16.msra.mxu1 %v1332_v2  ;;  %v425_v2 = vld [vmem:[#allocation7 + $0x350] sm:$0xff]  ;;  %v1362_v12 = vpack.c.bf16 %v438_v9, %v434_v7  ;;  %v442_v19 = vld [vmem:[#allocation7 + $0x3d8] sm:$0xff] }
  0xab   :  { %1335 = vmatprep.subr.bf16.mxu1 %v1334_v5  ;;  %1281 = vmatpush1.bf16.msra.mxu0 %v1280_v10  ;;  %v1360_v4 = vpack.c.bf16 %v429_v3, %v425_v2  ;;  %v432_v5 = vld [vmem:[#allocation7 + $0x388] sm:$0xff]  ;;  %v431_v10 = vld [vmem:[#allocation7 + $0x380] sm:$0xff]  ;;  %v446_v21 = vld [vmem:[#allocation7 + $0x3f8] sm:$0xff] }
  0xac   :  { %1283 = vmatprep.subr.bf16.mxu0 %v1282_v11  ;;  %v1298_v8 = vpack.c.bf16 %v436_v6, %v432_v5  ;;  %v435_v11 = vld [vmem:[#allocation7 + $0x3a0] sm:$0xff]  ;;  %v1366_v24 = vpack.c.bf16 %v446_v21, %v442_v19  ;;  %v618_v29 = vld [vmem:[#allocation10 + $0x8] sm:$0xff]  ;;  %v145_v35 = vld [vmem:[#allocation5] sm:$0xf] }
  0xad   :  { %v1300_v13 = vpack.c.bf16 %v435_v11, %v431_v10  ;;  %v620_v30 = vld [vmem:[#allocation10 + $0x18] sm:$0xff]  ;;  %v619_v54 = vld [vmem:[#allocation10 + $0x10] sm:$0xff]  ;;  %v622_v57 = vld [vmem:[#allocation10 + $0x28] sm:$0xff] }
  0xae   :  { %1337 = vmatpush1.bf16.msra.mxu1 %v1336_v14  ;;  %v433_v14 = vld [vmem:[#allocation7 + $0x390] sm:$0xff]  ;;  %v1370_v31 = vpack.c.bf16 %v620_v30, %v618_v29  ;;  %v624_v58 = vld [vmem:[#allocation10 + $0x38] sm:$0xff]  ;;  %v1372_v61 = vpack.c.bf16 %v619_v54, %v617_v53  ;;  %v625_v6 = vld [vmem:[#allocation10 + $0x40] sm:$0xff] }
  0xaf   :  { %1339 = vmatprep.subr.bf16.mxu1 %v1338_v17  ;;  %1285 = vmatpush1.bf16.msra.mxu0 %v1284_v22  ;;  %v1364_v16 = vpack.c.bf16 %v437_v15, %v433_v14  ;;  %v440_v17 = vld [vmem:[#allocation7 + $0x3c8] sm:$0xff]  ;;  %v439_v22 = vld [vmem:[#allocation7 + $0x3c0] sm:$0xff]  ;;  %v1374_v62 = vpack.c.bf16 %v624_v58, %v622_v57  ;;  %v627_v7 = vld [vmem:[#allocation10 + $0x50] sm:$0xff] }
  0xb0   :  { %1287 = vmatprep.subr.bf16.mxu0 %v1286_v23  ;;  %v1302_v20 = vpack.c.bf16 %v444_v18, %v440_v17  ;;  %v443_v23 = vld [vmem:[#allocation7 + $0x3e0] sm:$0xff]  ;;  %v626_v2 = vld [vmem:[#allocation10 + $0x48] sm:$0xff]  ;;  %v1380_v10 = vpack.c.bf16 %v627_v7, %v625_v6  ;;  %v643_v30 = vld [vmem:[#allocation10 + $0xd0] sm:$0xff] }
  0xb1   :  { %v1304_v25 = vpack.c.bf16 %v443_v23, %v439_v22  ;;  %v628_v3 = vld [vmem:[#allocation10 + $0x58] sm:$0xff]  ;;  %v634_v14 = vld [vmem:[#allocation10 + $0x88] sm:$0xff]  ;;  %v633_v18 = vld [vmem:[#allocation10 + $0x80] sm:$0xff] }
  0xb2   :  { %1341 = vmatpush1.bf16.msra.mxu1 %v1340_v26  ;;  %v441_v26 = vld [vmem:[#allocation7 + $0x3d0] sm:$0xff]  ;;  %v1378_v5 = vpack.c.bf16 %v628_v3, %v626_v2  ;;  %v632_v9 = vld [vmem:[#allocation10 + $0x78] sm:$0xff]  ;;  %v637_v23 = vld [vmem:[#allocation10 + $0xa0] sm:$0xff] }
  0xb3   :  { %1343 = vmatprep.subr.bf16.mxu1 %v1342_v27  ;;  %1289 = vmatpush1.bf16.msra.mxu0 %v1288_v32  ;;  %v445_v27 = vld [vmem:[#allocation7 + $0x3f0] sm:$0xff]  ;;  %v147_v32 = vlaneseq  ;;  %v636_v15 = vld [vmem:[#allocation10 + $0x98] sm:$0xff]  ;;  %v641_v29 = vld [vmem:[#allocation10 + $0xc0] sm:$0xff] }
  0xb4   :  { %1291 = vmatprep.subr.bf16.mxu0 %v1290_v47  ;;  %v1368_v28 = vpack.c.bf16 %v445_v27, %v441_v26  ;;  %v1386_v17 = vpack.c.bf16 %v636_v15, %v634_v14  ;;  %v638_v19 = vld [vmem:[#allocation10 + $0xa8] sm:$0xff]  ;;  %v644_v26 = vld [vmem:[#allocation10 + $0xd8] sm:$0xff]  ;;  %v655_v53 = vld [vmem:[#allocation10 + $0x130] sm:$0xff] }
  0xb5   :  { %v658_v54 = vld [vmem:[#allocation10 + $0x148] sm:$0xff]  ;;  %v657_v58 = vld [vmem:[#allocation10 + $0x140] sm:$0xff]  ;;  %v663_v2 = vld [vmem:[#allocation10 + $0x170] sm:$0xff] }
  0xb6   :  { %1345 = vmatpush1.bf16.msra.mxu1 %v1344_v33  ;;  %v1857_v33 = vshrl.u32 %v147_v32, 7  ;;  %v648_v32 = vld [vmem:[#allocation10 + $0xf8] sm:$0xff]  ;;  %v666_v3 = vld [vmem:[#allocation10 + $0x188] sm:$0xff]  ;;  %v665_v7 = vld [vmem:[#allocation10 + $0x180] sm:$0xff] }
  0xb7   :  { %1347 = vmatprep.subr.bf16.mxu1 %v1346_v34  ;;  %1293 = vmatpush1.bf16.msra.mxu0 %v1292_v52  ;;  %v671_v14 = vld [vmem:[#allocation10 + $0x1b0] sm:$0xff] }
  0xb8   :  { %1295 = vmatprep.subr.bf16.mxu0 %v1294_v59  ;;  %v1860_v34 = vsub.s32 0, %v1857_v33  ;;  %v1863_v37 = vsub.s32 1, %v1857_v33 }
  0xba   :  { %1349 = vmatpush1.bf16.msra.mxu1 %v1348_v39  ;;  %v157_v39 = vsub.s32 2, %v1857_v33  ;;  %v150_v41 = vrot.slane %v145_v35, %v1860_v34  ;;  %v154_v42 = vrot.slane %v145_v35, %v1863_v37 }
  0xbb   :  { %1351 = vmatprep.subr.bf16.mxu1 %v1350_v40  ;;  %1297 = vmatpush1.bf16.msra.mxu0 %v1296_v1  ;;  %v161_v40 = vsub.s32 3, %v1857_v33  ;;  %v623_v1 = vld [vmem:[#allocation10 + $0x30] sm:$0xff]  ;;  %v792_v33 = vld [vmem:[%s2029_s7 + $0xc8] sm:$0xff] }
  0xbc   :  { %1299 = vmatprep.subr.bf16.mxu0 %v1298_v8  ;;  %v630_v8 = vld [vmem:[#allocation10 + $0x68] sm:$0xff] }
  0xbd   :  { %v162_v44 = vrot.slane %v145_v35, %v161_v40  ;;  %v1382_v11 = vpack.c.bf16 %v632_v9, %v630_v8  ;;  %v667_v8 = vld [vmem:[#allocation10 + $0x190] sm:$0xff]  ;;  %v670_v9 = vld [vmem:[#allocation10 + $0x1a8] sm:$0xff] }
  0xbe   :  { %1353 = vmatpush1.bf16.msra.mxu1 %v1352_v43  ;;  %v158_v43 = vrot.slane %v145_v35, %v157_v39  ;;  %v1396_v35 = vpack.c.bf16 %v643_v30, %v641_v29  ;;  %v767_v29 = vld [vmem:[%s2029_s7] sm:$0xff] }
  0xbf   :  { %1355 = vmatprep.subr.bf16.mxu1 %v1354_v51  ;;  %1301 = vmatpush1.bf16.msra.mxu0 %v1300_v13  ;;  %v631_v13 = vld [vmem:[#allocation10 + $0x70] sm:$0xff] }
  0xc0   :  { %1303 = vmatprep.subr.bf16.mxu0 %v1302_v20  ;;  %v640_v20 = vld [vmem:[#allocation10 + $0xb8] sm:$0xff] }
  0xc1   :  { %v1390_v22 = vpack.c.bf16 %v640_v20, %v638_v19  ;;  %v675_v19 = vld [vmem:[#allocation10 + $0x1d0] sm:$0xff] }
  0xc2   :  { %1357 = vmatpush1.bf16.msra.mxu1 %v1356_v55 }
  0xc3   :  { %1359 = vmatprep.subr.bf16.mxu1 %v1358_v63  ;;  %1305 = vmatpush1.bf16.msra.mxu0 %v1304_v25  ;;  %v621_v63 = vld [vmem:[#allocation10 + $0x20] sm:$0xff]  ;;  %v642_v25 = vld [vmem:[#allocation10 + $0xc8] sm:$0xff] }
  0xc4   :  { %1371 = vmatprep.subr.bf16.mxu0 %v1370_v31  ;;  %v646_v31 = vld [vmem:[#allocation10 + $0xe8] sm:$0xff] }
  0xc6   :  { %1361 = vmatpush1.bf16.msra.mxu1 %v1360_v4  ;;  %v1376_v4 = vpack.c.bf16 %v623_v1, %v621_v63  ;;  %v661_v1 = vld [vmem:[#allocation10 + $0x160] sm:$0xff] }
  0xc7   :  { %1363 = vmatprep.subr.bf16.mxu1 %v1362_v12  ;;  %v629_v12 = vld [vmem:[#allocation10 + $0x60] sm:$0xff] }
  0xca   :  { %1365 = vmatpush1.bf16.msra.mxu1 %v1364_v16  ;;  %v1384_v16 = vpack.c.bf16 %v631_v13, %v629_v12  ;;  %v669_v13 = vld [vmem:[#allocation10 + $0x1a0] sm:$0xff] }
  0xcb   :  { %1367 = vmatprep.subr.bf16.mxu1 %v1366_v24  ;;  %v639_v24 = vld [vmem:[#allocation10 + $0xb0] sm:$0xff]  ;;  %v1424_v15 = vpack.c.bf16 %v671_v14, %v669_v13 }
  0xcc   :  { %v1392_v27 = vpack.c.bf16 %v639_v24, %v637_v23  ;;  %v677_v24 = vld [vmem:[#allocation10 + $0x1e0] sm:$0xff] }
  0xce   :  { %1369 = vmatpush1.bf16.msra.mxu1 %v1368_v28  ;;  %v1394_v28 = vpack.c.bf16 %v644_v26, %v642_v25  ;;  %v679_v25 = vld [vmem:[#allocation10 + $0x1f0] sm:$0xff] }
  0xcf   :  { %v1432_v26 = vpack.c.bf16 %v679_v25, %v677_v24  ;;  %v793_v24 = vld [vmem:[%s2029_s7 + $0xd0] sm:$0xff] }
 0x15c   :  { %v237_v36 = vpop.f32.mrb[0].mxu1 }
 0x15d   :  { %v239_v38 = vpop.f32.mrb[1].mxu1  ;;  %v238_v45 = vadd.f32 %v237_v36, %v150_v41  ;;  %v1398_v36 = vpack.c.bf16 %v648_v32, %v646_v31  ;;  %v647_v41 = vld [vmem:[#allocation10 + $0xf0] sm:$0xff]  ;;  %v769_v31 = vld [vmem:[%s2029_s7 + $0x10] sm:$0xff]  ;;  %v772_v32 = vld [vmem:[%s2029_s7 + $0x28] sm:$0xff] }
 0x15e   :  { %v240_v46 = vadd.f32 %v239_v38, %v154_v42  ;;  %v645_v38 = vld [vmem:[#allocation10 + $0xe0] sm:$0xff]  ;;  %v650_v42 = vld [vmem:[#allocation10 + $0x108] sm:$0xff] }
 0x15f   :  { %v313_v51 = vmax.f32 %v238_v45, 0.0 }
 0x160   :  { %v314_v55 = vmax.f32 %v240_v46, 0.0  ;;  %v649_v46 = vld [vmem:[#allocation10 + $0x100] sm:$0xff] }
 0x164   :  { %v308_v47 = vpop.f32.mrb[2].mxu1 }
 0x165   :  { %v309_v48 = vadd.f32 %v308_v47, %v158_v43  ;;  %v310_v49 = vpop.f32.mrb[3].mxu1  ;;  %v652_v43 = vld [vmem:[#allocation10 + $0x118] sm:$0xff]  ;;  %v651_v47 = vld [vmem:[#allocation10 + $0x110] sm:$0xff] }
 0x166   :  { %v311_v50 = vadd.f32 %v310_v49, %v162_v44  ;;  %v1400_v44 = vpack.c.bf16 %v647_v41, %v645_v38  ;;  %v1402_v45 = vpack.c.bf16 %v652_v43, %v650_v42  ;;  %v656_v49 = vld [vmem:[#allocation10 + $0x138] sm:$0xff]  ;;  %v773_v42 = vld [vmem:[%s2029_s7 + $0x30] sm:$0xff]  ;;  %v776_v43 = vld [vmem:[%s2029_s7 + $0x48] sm:$0xff] }
 0x167   :  { %v315_v52 = vmax.f32 %v309_v48, 0.0  ;;  %v654_v48 = vld [vmem:[#allocation10 + $0x128] sm:$0xff]  ;;  %v771_v41 = vld [vmem:[%s2029_s7 + $0x20] sm:$0xff] }
 0x168   :  { %v316_v56 = vmax.f32 %v311_v50, 0.0  ;;  %v1404_v50 = vpack.c.bf16 %v651_v47, %v649_v46  ;;  %v775_v47 = vld [vmem:[%s2029_s7 + $0x40] sm:$0xff] }
 0x169   :  { %v317_v59 = vmax.f32 %v313_v51, %v315_v52  ;;  %v1406_v51 = vpack.c.bf16 %v656_v49, %v654_v48  ;;  %v653_v52 = vld [vmem:[#allocation10 + $0x120] sm:$0xff]  ;;  %v777_v48 = vld [vmem:[%s2029_s7 + $0x50] sm:$0xff] }
 0x16a   :  { %v318_v60 = vmax.f32 %v314_v55, %v316_v56  ;;  %v660_v55 = vld [vmem:[#allocation10 + $0x158] sm:$0xff]  ;;  %v1408_v56 = vpack.c.bf16 %v655_v53, %v653_v52  ;;  %v780_v49 = vld [vmem:[%s2029_s7 + $0x68] sm:$0xff] }
 0x16b   :  { %v1410_v57 = vpack.c.bf16 %v660_v55, %v658_v54  ;;  %v779_v53 = vld [vmem:[%s2029_s7 + $0x60] sm:$0xff]  ;;  %v781_v54 = vld [vmem:[%s2029_s7 + $0x70] sm:$0xff]  ;;  %v784_v55 = vld [vmem:[%s2029_s7 + $0x88] sm:$0xff] }
 0x16c   :  { %533 = vmatprep.mubr.f32.mxu0 %v318_v60  ;;  %604 = vmatprep.mubr.f32.mxu1 %v318_v60  ;;  %v662_v60 = vld [vmem:[#allocation10 + $0x168] sm:$0xff] }
 0x16d   :  { %534 = vmatmul.mubr.f32.vlgmr.msra.gmra.mrb[0].mxu0 %v317_v59  ;;  %605 = vmatmul.mubr.f32.vlgmr.msra.gmra.mrb[4].mxu1 %v317_v59  ;;  %v659_v59 = vld [vmem:[#allocation10 + $0x150] sm:$0xff] }
 0x16e   :  { %1373 = vmatpush1.bf16.msra.mxu0 %v1372_v61  ;;  %875 = vmatprep.mubr.f32.mxu1 %v1684_v0  ;;  %v635_v0 = vld [vmem:[#allocation10 + $0x90] sm:$0xff]  ;;  %v664_v61 = vld [vmem:[#allocation10 + $0x178] sm:$0xff] }
 0x16f   :  { %1375 = vmatprep.subr.bf16.mxu0 %v1374_v62  ;;  %v1388_v21 = vpack.c.bf16 %v635_v0, %v633_v18  ;;  %v1412_v62 = vpack.c.bf16 %v659_v59, %v657_v58  ;;  %v1414_v63 = vpack.c.bf16 %v664_v61, %v662_v60  ;;  %v673_v0 = vld [vmem:[#allocation10 + $0x1c0] sm:$0xff]  ;;  %v783_v59 = vld [vmem:[%s2029_s7 + $0x80] sm:$0xff]  ;;  %v785_v60 = vld [vmem:[%s2029_s7 + $0x90] sm:$0xff] }
 0x170   :  { %v1428_v20 = vpack.c.bf16 %v675_v19, %v673_v0  ;;  %v788_v61 = vld [vmem:[%s2029_s7 + $0xa8] sm:$0xff] }
 0x172   :  { %1377 = vmatpush1.bf16.msra.mxu0 %v1376_v4  ;;  %v668_v4 = vld [vmem:[#allocation10 + $0x198] sm:$0xff] }
 0x173   :  { %1379 = vmatprep.subr.bf16.mxu0 %v1378_v5  ;;  %v1416_v5 = vpack.c.bf16 %v663_v2, %v661_v1  ;;  %v1418_v6 = vpack.c.bf16 %v668_v4, %v666_v3  ;;  %v787_v2 = vld [vmem:[%s2029_s7 + $0xa0] sm:$0xff]  ;;  %v789_v3 = vld [vmem:[%s2029_s7 + $0xb0] sm:$0xff] }
 0x174   :  { %v1456_v4 = vpack.c.bf16 %v789_v3, %v787_v2  ;;  %v904_v2 = vld [vmem:[%s2031_s9 + $0x30] sm:$0xff] }
 0x176   :  { %1381 = vmatpush1.bf16.msra.mxu0 %v1380_v10  ;;  %v672_v10 = vld [vmem:[#allocation10 + $0x1b8] sm:$0xff] }
 0x177   :  { %1383 = vmatprep.subr.bf16.mxu0 %v1382_v11  ;;  %v1420_v11 = vpack.c.bf16 %v667_v8, %v665_v7  ;;  %v1422_v12 = vpack.c.bf16 %v672_v10, %v670_v9 }
 0x17a   :  { %1385 = vmatpush1.bf16.msra.mxu0 %v1384_v16  ;;  %v674_v16 = vld [vmem:[#allocation10 + $0x1c8] sm:$0xff] }
 0x17b   :  { %1387 = vmatprep.subr.bf16.mxu0 %v1386_v17  ;;  %v676_v17 = vld [vmem:[#allocation10 + $0x1d8] sm:$0xff] }
 0x17c   :  { %v1426_v18 = vpack.c.bf16 %v676_v17, %v674_v16 }
 0x17e   :  { %1389 = vmatpush1.bf16.msra.mxu0 %v1388_v21  ;;  %v678_v21 = vld [vmem:[#allocation10 + $0x1e8] sm:$0xff] }
 0x17f   :  { %1391 = vmatprep.subr.bf16.mxu0 %v1390_v22  ;;  %v680_v22 = vld [vmem:[#allocation10 + $0x1f8] sm:$0xff] }
 0x180   :  { %v1430_v23 = vpack.c.bf16 %v680_v22, %v678_v21 }
 0x182   :  { %1393 = vmatpush1.bf16.msra.mxu0 %v1392_v27  ;;  %v768_v27 = vld [vmem:[%s2029_s7 + $0x8] sm:$0xff] }
 0x183   :  { %1395 = vmatprep.subr.bf16.mxu0 %v1394_v28  ;;  %v770_v28 = vld [vmem:[%s2029_s7 + $0x18] sm:$0xff] }
 0x184   :  { %v1434_v30 = vpack.c.bf16 %v770_v28, %v768_v27  ;;  %v798_v27 = vld [vmem:[%s2029_s7 + $0xf8] sm:$0xff] }
 0x186   :  { %1397 = vmatpush1.bf16.msra.mxu0 %v1396_v35  ;;  %v774_v35 = vld [vmem:[%s2029_s7 + $0x38] sm:$0xff]  ;;  %1435 = vmatprep.subr.bf16.mxu1 %v1434_v30  ;;  %v797_v30 = vld [vmem:[%s2029_s7 + $0xf0] sm:$0xff] }
 0x187   :  { %1399 = vmatprep.subr.bf16.mxu0 %v1398_v36  ;;  %v1436_v36 = vpack.c.bf16 %v769_v31, %v767_v29  ;;  %v1438_v38 = vpack.c.bf16 %v774_v35, %v772_v32  ;;  %v795_v29 = vld [vmem:[%s2029_s7 + $0xe0] sm:$0xff]  ;;  %v681_v32 = vld [vmem:[#allocation11] sm:$0x3] }
 0x188   :  { %v1464_v31 = vpack.c.bf16 %v797_v30, %v795_v29  ;;  %v686_v35 = vrot.slane %v681_v32, %v1860_v34 }
 0x189   :  { %1437 = vmatpush1.bf16.msra.mxu1 %v1436_v36  ;;  %v690_v36 = vrot.slane %v681_v32, %v1863_v37 }
 0x18a   :  { %1401 = vmatpush1.bf16.msra.mxu0 %v1400_v44  ;;  %v778_v44 = vld [vmem:[%s2029_s7 + $0x58] sm:$0xff]  ;;  %1439 = vmatprep.subr.bf16.mxu1 %v1438_v38 }
 0x18b   :  { %1403 = vmatprep.subr.bf16.mxu0 %v1402_v45  ;;  %v1440_v45 = vpack.c.bf16 %v773_v42, %v771_v41  ;;  %v1442_v46 = vpack.c.bf16 %v778_v44, %v776_v43 }
 0x18d   :  { %1441 = vmatpush1.bf16.msra.mxu1 %v1440_v45 }
 0x18e   :  { %1405 = vmatpush1.bf16.msra.mxu0 %v1404_v50  ;;  %v782_v50 = vld [vmem:[%s2029_s7 + $0x78] sm:$0xff]  ;;  %1443 = vmatprep.subr.bf16.mxu1 %v1442_v46 }
 0x18f   :  { %1407 = vmatprep.subr.bf16.mxu0 %v1406_v51  ;;  %v1444_v51 = vpack.c.bf16 %v777_v48, %v775_v47  ;;  %v1446_v52 = vpack.c.bf16 %v782_v50, %v780_v49  ;;  %v899_v47 = vld [vmem:[%s2031_s9 + $0x8] sm:$0xff]  ;;  %v898_v48 = vld [vmem:[%s2031_s9] sm:$0xff]  ;;  %v901_v49 = vld [vmem:[%s2031_s9 + $0x18] sm:$0xff] }
 0x190   :  { %v799_v50 = vld [vmem:[#allocation13] sm:$0x3] }
 0x191   :  { %1445 = vmatpush1.bf16.msra.mxu1 %v1444_v51  ;;  %v804_v51 = vrot.slane %v799_v50, %v1860_v34 }
 0x192   :  { %1409 = vmatpush1.bf16.msra.mxu0 %v1408_v56  ;;  %v786_v56 = vld [vmem:[%s2029_s7 + $0x98] sm:$0xff]  ;;  %1447 = vmatprep.subr.bf16.mxu1 %v1446_v52  ;;  %v808_v52 = vrot.slane %v799_v50, %v1863_v37 }
 0x193   :  { %1411 = vmatprep.subr.bf16.mxu0 %v1410_v57  ;;  %v1448_v57 = vpack.c.bf16 %v781_v54, %v779_v53  ;;  %v1450_v58 = vpack.c.bf16 %v786_v56, %v784_v55 }
 0x195   :  { %1449 = vmatpush1.bf16.msra.mxu1 %v1448_v57 }
 0x196   :  { %1413 = vmatpush1.bf16.msra.mxu0 %v1412_v62  ;;  %v790_v62 = vld [vmem:[%s2029_s7 + $0xb8] sm:$0xff]  ;;  %1451 = vmatprep.subr.bf16.mxu1 %v1450_v58 }
 0x197   :  { %1415 = vmatprep.subr.bf16.mxu0 %v1414_v63  ;;  %v1452_v63 = vpack.c.bf16 %v785_v60, %v783_v59  ;;  %v1454_v1 = vpack.c.bf16 %v790_v62, %v788_v61  ;;  %v900_v59 = vld [vmem:[%s2031_s9 + $0x10] sm:$0xff]  ;;  %v903_v61 = vld [vmem:[%s2031_s9 + $0x28] sm:$0xff] }
 0x199   :  { %1453 = vmatpush1.bf16.msra.mxu1 %v1452_v63  ;;  %v905_v63 = vld [vmem:[%s2031_s9 + $0x38] sm:$0xff] }
 0x19a   :  { %1417 = vmatpush1.bf16.msra.mxu0 %v1416_v5  ;;  %1455 = vmatprep.subr.bf16.mxu1 %v1454_v1  ;;  %v447_v5 = vld [vmem:[#allocation8] sm:$0xf] }
 0x19b   :  { %1419 = vmatprep.subr.bf16.mxu0 %v1418_v6  ;;  %v452_v6 = vrot.slane %v447_v5, %v1860_v34  ;;  %v460_v7 = vrot.slane %v447_v5, %v157_v39  ;;  %v456_v8 = vrot.slane %v447_v5, %v1863_v37  ;;  %v464_v9 = vrot.slane %v447_v5, %v161_v40  ;;  %v794_v39 = vld [vmem:[%s2029_s7 + $0xd8] sm:$0xff]  ;;  %v902_v37 = vld [vmem:[%s2031_s9 + $0x20] sm:$0xff]  ;;  %s1641_s9 = scalar_lea.vmem %s1208_s13, 32 }
 0x19c   :  { %v1458_v40 = vpack.c.bf16 %v794_v39, %v792_v33  ;;  %v1225_v5 = vld [vmem:[%s2032_s10] ss:$0 sm:$0xff]  ;;  %p1642_p0 = scmp.ne.s32.totalorder %s1208_s13, %s1641_s9  ;;  %p1647_p2 = scmp.lt.s32.totalorder %s1641_s9, %s1641_s9 }
 0x19d   :  { %1457 = vmatpush1.bf16.msra.mxu1 %v1456_v4 }
 0x19e   :  { %1421 = vmatpush1.bf16.msra.mxu0 %v1420_v11  ;;  %1459 = vmatprep.subr.bf16.mxu1 %v1458_v40  ;;  %p1648_p3 = por %p1647_p2, %p1646_p1 }
 0x19f   :  { %1423 = vmatprep.subr.bf16.mxu0 %v1422_v12 }
 0x1a0   :  { %p1649_p4 = pnand %p1648_p3, %p1642_p0 }
 0x1a2   :  { %1425 = vmatpush1.bf16.msra.mxu0 %v1424_v15 }
 0x1a3   :  { %1427 = vmatprep.subr.bf16.mxu0 %v1426_v18 }
 0x1a6   :  { %1429 = vmatpush1.bf16.msra.mxu0 %v1428_v20 }
 0x1a7   :  { %1431 = vmatprep.subr.bf16.mxu0 %v1430_v23  ;;  %v791_v23 = vld [vmem:[%s2029_s7 + $0xc0] sm:$0xff] }
 0x1a8   :  { %v1460_v25 = vpack.c.bf16 %v793_v24, %v791_v23 }
 0x1aa   :  { %1433 = vmatpush1.bf16.msra.mxu0 %v1432_v26  ;;  %1461 = vmatpush1.bf16.msra.mxu1 %v1460_v25  ;;  %v796_v26 = vld [vmem:[%s2029_s7 + $0xe8] sm:$0xff] }
 0x1ab   :  { %v1462_v28 = vpack.c.bf16 %v798_v27, %v796_v26 }
 0x1ad   :  { %1463 = vmatprep.subr.bf16.mxu1 %v1462_v28 }
 0x1ae   :  { %1465 = vmatpush1.bf16.msra.mxu1 %v1464_v31 }
 0x1af   :  { %913 = vmatprep.subr.mxu1 %v899_v47 }
 0x240   :  { %v535_v10 = vpop.f32.mrb[0].mxu0  ;;  %v606_v11 = vpop.f32.mrb[4].mxu1 }
 0x241   :  { %v536_v12 = vadd.f32 %v535_v10, %v452_v6  ;;  %v607_v13 = vadd.f32 %v606_v11, %v460_v7  ;;  %v537_v14 = vpop.f32.mrb[1].mxu0  ;;  %v608_v15 = vpop.f32.mrb[5].mxu1 }
 0x242   :  { %v538_v16 = vadd.f32 %v537_v14, %v456_v8  ;;  %v609_v17 = vadd.f32 %v608_v15, %v464_v9 }
 0x243   :  { %v611_v18 = vmax.f32 %v536_v12, 0.0  ;;  %v613_v0 = vmax.f32 %v607_v13, 0.0 }
 0x244   :  { %v612_v19 = vmax.f32 %v538_v16, 0.0  ;;  %v614_v20 = vmax.f32 %v609_v17, 0.0 }
 0x245   :  { %v615_v21 = vmax.f32 %v611_v18, %v613_v0 }
 0x246   :  { %v616_v22 = vmax.f32 %v612_v19, %v614_v20 }
 0x248   :  { %757 = vmatprep.mubr.f32.mxu0 %v616_v22 }
 0x249   :  { %758 = vmatmul.mubr.f32.vlgmr.msra.gmra.mrb[2].mxu0 %v615_v21 }
 0x31c   :  { %v759_v38 = vpop.f32.mrb[2].mxu0 }
 0x31d   :  { %v760_v41 = vadd.f32 %v759_v38, %v686_v35  ;;  %v761_v42 = vpop.f32.mrb[3].mxu0 }
 0x31e   :  { %v762_v43 = vadd.f32 %v761_v42, %v690_v36 }
 0x31f   :  { %v764_v44 = vmax.f32 %v760_v41, 0.0 }
 0x320   :  { %v765_v45 = vmax.f32 %v762_v43, 0.0 }
 0x322   :  { %v766_v46 = vmax.f32 %v764_v44, %v765_v45 }
 0x324   :  { %876 = vmatmul.mubr.f32.vlgmr.msra.gmra.mrb[6].mxu1 %v766_v46 }
 0x325   :  { %914 = vmatpush1.xpose.msra.mxu1 %v898_v48 }
 0x326   :  { %983 = vmatprep.subr.mxu1 %v901_v49 }
 0x3f7   :  { %v877_v53 = vpop.f32.mrb[6].mxu1 }
 0x3f8   :  { %v878_v54 = vadd.f32 %v877_v53, %v804_v51  ;;  %v879_v55 = vpop.f32.mrb[7].mxu1 }
 0x3f9   :  { %v880_v56 = vadd.f32 %v879_v55, %v808_v52 }
 0x3fa   :  { %v882_v58 = vmax.f32 %v878_v54, 0.0 }
 0x3fb   :  { %v883_v57 = vmax.f32 %v880_v56, 0.0 }
 0x3fc   :  { %v886_v34 = vrot.slane %v882_v58, 2  ;;  %v890_v1 = vrot.slane %v882_v58, 4  ;;  %v894_v4 = vrot.slane %v882_v58, 6 }
 0x3fd   :  { %977 = vmatprep.mubr.f32.mxu1 %v883_v57  ;;  %v887_v60 = vrot.slane %v883_v57, 2  ;;  %v891_v62 = vrot.slane %v883_v57, 4  ;;  %v895_v3 = vrot.slane %v883_v57, 6 }
 0x3fe   :  { %978 = vmatmul.mubr.f32.vlgmr.msra.gmra.mrb[8].mxu1 %v882_v58 }
 0x3ff   :  { %984 = vmatpush1.xpose.msra.mxu1 %v900_v59  ;;  %1047 = vmatprep.mubr.f32.mxu1 %v887_v60 }
 0x400   :  { %1053 = vmatprep.subr.mxu1 %v903_v61 }
 0x406   :  { %1048 = vmatmul.mubr.f32.vlgmr.msra.gmra.mrb[8].mxu1 %v886_v34 }
 0x407   :  { %1054 = vmatpush1.xpose.msra.mxu1 %v902_v37  ;;  %1117 = vmatprep.mubr.f32.mxu1 %v891_v62 }
 0x408   :  { %1123 = vmatprep.subr.mxu1 %v905_v63 }
 0x40e   :  { %1118 = vmatmul.mubr.f32.vlgmr.msra.gmra.mrb[8].mxu1 %v890_v1 }
 0x40f   :  { %1124 = vmatpush1.xpose.msra.mxu1 %v904_v2  ;;  %1187 = vmatprep.mubr.f32.mxu1 %v895_v3 }
 0x416   :  { %1188 = vmatmul.mubr.f32.vlgmr.msra.gmra.mrb[8].mxu1 %v894_v4 }
 0x4e9   :  { %v1189_v6 = vpop.f32.mrb[8].mxu1 }
 0x4ea   :  { %v1466_v7 = vadd.f32 %v1225_v5, %v1189_v6  ;;  %v1191_v8 = vpop.f32.mrb[9].mxu1 }
 0x4ec   :  { %1196 = vrot.lane.b32.xlu0 %v1466_v7, %s1686_s14  ;;  %1194 = vst.msk [vmem:[#allocation14] sm:$0x3] %vm1193_vm1, %v1466_v7 }
 0x4ed   :  { %1652 = shalt.err (!%p1649_p4)
}
 0x4ee   :  { %s1653_s10 = scalar_lea.hbm %s2033_s11, 32 }
 0x4ef   :  { %p1654_p5 = scmp.ne.s32.totalorder %s2033_s11, %s1653_s10  ;;  %p1657_p6 = scmp.lt.u32.totalorder %s1653_s10, %s2033_s11 }
 0x4f1   :  { %p1659_p7 = pnand %p1657_p6, %p1654_p5 }
 0x4f3   :  { %1662 = shalt.err (!%p1659_p7)
}
 0x4f4   :  { %1210 = dma.vmem_to_hbm [thread:$0]  %s1208_s13, 32, %s2033_s11, [#allocation4]   ;;  %vm1199_vm2 = vcmask 1024  }
 0x55e   :  { %v1197_v9 = vpop.permute.xlu0 %1196 }
 0x55f   :  { %1200 = vst.msk [vmem:[%s2034_s12] sm:$0x3] %vm1199_vm2, %v1197_v9 }
 0x560   :  { %1671 = dma.done.wait [#allocation4], 32  }
 0x561   :  { %1672 = vsyncadd [#allocation4], 4294967264 }
 0x562   :  { %1218 = vsyncpa [#allocation3], 1 }
 0x563   :  { %1219 = vsyncpa [#allocation6], 1 }
 0x564   :  { %1220 = vsyncpa [#allocation9], 1 }
 0x565   :  { %1221 = vsyncpa [#allocation12], 1 }
 0x566   :  { %1222 = vsyncpa [#allocation4], 1 }

</bundles_post_ra>
